<compile_context>
chip_gen: v6e
topology: v6e:2x2x1
jax: 0.10.0
libtpu: 0.0.40
codegen_flags: <defaults>
</compile_context>

<pallas_src>
import jax
import jax.numpy as jnp
from jax.experimental import pallas as pl
from jax.experimental.pallas import tpu as pltpu


def _bn_fold(gamma, beta, mean, var, eps=1e-5):
    scale = gamma / jnp.sqrt(var + eps)
    bias = beta - mean * scale
    return scale, bias


def _pad_up(a, m):
    return ((a + m - 1) // m) * m


def mbconv_pallas(x_nchw, p, *, io_dtype=jnp.float32, mxu_dtype=jnp.bfloat16):
    """x_nchw: (N, Cin, H, W) float32.  p: parameter dict (PyTorch layouts)."""
    N, Cin, H, W = x_nchw.shape
    HW = H * W
    mid = p["w1"].shape[0]
    Cout = p["w2"].shape[0]
    R = max(mid, Cout)

    # ---- fold inference BatchNorm into the conv weights (wrapper-side) -----
    s1, b1 = _bn_fold(p["g1"], p["be1"], p["m1"], p["v1"])
    sd, bd = _bn_fold(p["gd"], p["bed"], p["md"], p["vd"])
    s2, b2 = _bn_fold(p["g2"], p["be2"], p["m2"], p["v2"])

    w1k = (p["w1"][:, :, 0, 0] * s1[:, None]).astype(mxu_dtype)        # (mid, Cin)
    w2k = (p["w2"][:, :, 0, 0] * s2[:, None]).astype(mxu_dtype)        # (Cout, mid)
    wdk = (p["wd"][:, 0] * sd[:, None, None]).reshape(mid, 9)          # (mid, 9) f32

    # One small consolidated per-channel parameter tile:
    #   cols 0..8 = depthwise taps, col 9 = b1, col 10 = bd, col 11 = b2.
    wdb = jnp.zeros((R, 12), jnp.float32)
    wdb = wdb.at[:mid, 0:9].set(wdk)
    wdb = wdb.at[:mid, 9].set(b1)
    wdb = wdb.at[:mid, 10].set(bd)
    wdb = wdb.at[:Cout, 11].set(b2)

    # Precomputed edge-validity masks for the 9 depthwise taps (spatial axis is
    # flattened into the lane dimension as p = h*W + w).
    hh = jnp.repeat(jnp.arange(H), W)                                  # (HW,)
    ww = jnp.tile(jnp.arange(W), H)                                    # (HW,)

    def _ok(pos, d, n):
        if d == 0:
            return pos >= 1
        if d == 2:
            return pos <= n - 2
        return jnp.ones_like(pos, dtype=bool)

    tap_masks = jnp.stack(
        [(_ok(hh, dh, H) & _ok(ww, dw, W)).astype(jnp.float32)
         for dh in range(3) for dw in range(3)])                       # (9, HW)

    # ---- input: zero-copy reshape of NCHW, no transpose / pad / gather -----
    x_flat = x_nchw.reshape(N, Cin, HW).astype(io_dtype)               # (N, Cin, HW)

    # ---- kernel -------------------------------------------------------------
    def kernel(x_ref, w1_ref, wdb_ref, mask_ref, w2_ref, o_ref):
        # stage 1: 1x1 conv (Cin -> mid), folded BN, ReLU6
        xt = x_ref[0]                                                  # (Cin, HW)
        if xt.dtype != mxu_dtype:
            xt = xt.astype(mxu_dtype)
        h = jnp.dot(w1_ref[...], xt, preferred_element_type=jnp.float32)
        h = jnp.clip(h + wdb_ref[0:mid, 9:10], 0.0, 6.0)               # (mid, HW) f32

        # stage 2: 3x3 depthwise (stride 1, same pad) via lane rolls + masks
        acc = None
        for dh in range(3):
            for dw in range(3):
                tap = dh * 3 + dw
                off = (dh - 1) * W + (dw - 1)
                if off == 0:
                    v = h                                              # center tap
                else:
                    v = pltpu.roll(h, shift=(-off) % HW, axis=1)
                    v = v * mask_ref[tap:tap + 1, :]                   # zero padding
                term = v * wdb_ref[0:mid, tap:tap + 1]                 # per-channel w
                acc = term if acc is None else acc + term
        acc = jnp.clip(acc + wdb_ref[0:mid, 10:11], 0.0, 6.0)          # (mid, HW) f32

        # stage 3: 1x1 conv (mid -> Cout), folded BN, no activation
        a = acc if acc.dtype == mxu_dtype else acc.astype(mxu_dtype)
        y = jnp.dot(w2_ref[...], a, preferred_element_type=jnp.float32)
        y = y + wdb_ref[0:Cout, 11:12]
        o_ref[0] = y.astype(o_ref.dtype)                               # (Cout, HW)

    # ---- VMEM budget from actual (padded) block sizes -----------------------
    io_b = jnp.dtype(io_dtype).itemsize
    mx_b = jnp.dtype(mxu_dtype).itemsize
    blk_bytes = (
        _pad_up(Cin, 8) * _pad_up(HW, 128) * io_b          # x block
        + _pad_up(mid, 8) * _pad_up(Cin, 128) * mx_b       # w1
        + _pad_up(R, 8) * 128 * 4                          # wdb
        + _pad_up(9, 8) * _pad_up(HW, 128) * 4              # tap masks
        + _pad_up(Cout, 8) * _pad_up(mid, 128) * mx_b      # w2
        + _pad_up(Cout, 8) * _pad_up(HW, 128) * io_b)      # out block
    vmem_limit = int(max(4 * 1024 * 1024, 4 * blk_bytes))  # 2x buffers + slack

    const2 = lambda n: (0, 0)
    out = pl.pallas_call(
        kernel,
        out_shape=jax.ShapeDtypeStruct((N, Cout, HW), io_dtype),
        grid_spec=pltpu.PrefetchScalarGridSpec(
            num_scalar_prefetch=0,
            grid=(N,),
            in_specs=[
                pl.BlockSpec((1, Cin, HW), lambda n: (n, 0, 0)),
                pl.BlockSpec((mid, Cin), const2),
                pl.BlockSpec((R, 12), const2),
                pl.BlockSpec((9, HW), const2),
                pl.BlockSpec((Cout, mid), const2),
            ],
            out_specs=pl.BlockSpec((1, Cout, HW), lambda n: (n, 0, 0)),
        ),
        compiler_params=pltpu.CompilerParams(
            dimension_semantics=("parallel",),
            vmem_limit_bytes=vmem_limit),
    )(x_flat, w1k, wdb, tap_masks, w2k)

    # zero-copy back to NCHW; return f32 like the reference module
    return out.reshape(N, Cout, H, W).astype(jnp.float32)


def mbconv_ref(x, p):
    """Pure-JAX NCHW reference mirroring the PyTorch forward (eval-mode BN)."""
    def bn(t, g, b, m, v, eps=1e-5):
        g, b, m, v = (a[None, :, None, None] for a in (g, b, m, v))
        return (t - m) / jnp.sqrt(v + eps) * g + b

    mid = p["w1"].shape[0]
    h = jax.lax.conv_general_dilated(x, p["w1"], (1, 1), "VALID")
    h = jnp.clip(bn(h, p["g1"], p["be1"], p["m1"], p["v1"]), 0.0, 6.0)
    h = jax.lax.conv_general_dilated(h, p["wd"], (1, 1), ((1, 1), (1, 1)),
                                     feature_group_count=mid)
    h = jnp.clip(bn(h, p["gd"], p["bed"], p["md"], p["vd"]), 0.0, 6.0)
    h = jax.lax.conv_general_dilated(h, p["w2"], (1, 1), "VALID")
    return bn(h, p["g2"], p["be2"], p["m2"], p["v2"])


def make_params(key, c_in, c_out, expand_ratio=6):
    mid = int(round(c_in * expand_ratio))
    ks = jax.random.split(key, 16)
    u = lambda k, s: jax.random.uniform(k, s, jnp.float32, -0.5, 0.5)
    pos = lambda k, s: jax.random.uniform(k, s, jnp.float32, 0.5, 1.5)
    return dict(
        # conv weights (PyTorch OIHW layouts, bias=False)
        w1=u(ks[0], (mid, c_in, 1, 1)),
        wd=u(ks[1], (mid, 1, 3, 3)),
        w2=u(ks[2], (c_out, mid, 1, 1)),
        # BN params (gamma, beta, running_mean, running_var) per stage
        g1=pos(ks[3], (mid,)), be1=u(ks[4], (mid,)), m1=u(ks[5], (mid,)), v1=pos(ks[6], (mid,)),
        gd=pos(ks[7], (mid,)), bed=u(ks[8], (mid,)), md=u(ks[9], (mid,)), vd=pos(ks[10], (mid,)),
        g2=pos(ks[11], (c_out,)), be2=u(ks[12], (c_out,)), m2=u(ks[13], (c_out,)), v2=pos(ks[14], (c_out,)),
    ), mid


if __name__ == "__main__":
    key = jax.random.PRNGKey(0)
    k_x, k_p = jax.random.split(key)

    N, C_in, H, W = 2, 4, 16, 16
    C_out = 8
    x = jax.random.normal(k_x, (N, C_in, H, W), jnp.float32)
    params, mid = make_params(k_p, C_in, C_out, expand_ratio=6)

    ref = jax.block_until_ready(mbconv_ref(x, params))

    # Strict-tolerance check: f32 I/O and f32 MXU.
    out = jax.block_until_ready(
        mbconv_pallas(x, params, io_dtype=jnp.float32, mxu_dtype=jnp.float32))
    assert out.shape == (N, C_out, H, W), out.shape
    assert jnp.allclose(out, ref, rtol=1e-4, atol=1e-4), \
        float(jnp.max(jnp.abs(out - ref)))

    # Performance-default path: bf16 I/O + bf16 MXU (f32 accumulate / f32 VPU);
    # only bf16 quantization error vs. the f32 reference.
    out_fast = jax.block_until_ready(
        mbconv_pallas(x, params, io_dtype=jnp.bfloat16, mxu_dtype=jnp.bfloat16))
    assert float(jnp.max(jnp.abs(out_fast - ref))) < 0.3, \
        float(jnp.max(jnp.abs(out_fast - ref)))

    print("KERNEL_OK")
</pallas_src>

<mosaic_0001>
module attributes {stable_mosaic.version = 11 : i64} {
  func.func @kernel(%arg0: i32, %arg1: memref<1x4x256xf32, #tpu.memory_space<vmem>>, %arg2: memref<24x4xf32, #tpu.memory_space<vmem>>, %arg3: memref<24x12xf32, #tpu.memory_space<vmem>>, %arg4: memref<9x256xf32, #tpu.memory_space<vmem>>, %arg5: memref<8x24xf32, #tpu.memory_space<vmem>>, %arg6: memref<1x8x256xf32, #tpu.memory_space<vmem>>) attributes {dimension_semantics = [#tpu.dimension_semantics<parallel>], iteration_bounds = array<i64: 2>, scalar_prefetch = 0 : i64, scratch_operands = 0 : i64, tpu.core_type = #tpu.core_type<tc>, window_params = [{transform_indices = @transform_0, window_bounds = array<i64: 1, 4, 256>}, {pipeline_mode = #tpu.pipeline_mode<synchronous>, transform_indices = @transform_1, window_bounds = array<i64: 24, 4>}, {pipeline_mode = #tpu.pipeline_mode<synchronous>, transform_indices = @transform_2, window_bounds = array<i64: 24, 12>}, {pipeline_mode = #tpu.pipeline_mode<synchronous>, transform_indices = @transform_3, window_bounds = array<i64: 9, 256>}, {pipeline_mode = #tpu.pipeline_mode<synchronous>, transform_indices = @transform_4, window_bounds = array<i64: 8, 24>}, {transform_indices = @transform_5, window_bounds = array<i64: 1, 8, 256>}]} {
    %c0 = arith.constant 0 : index
    %c0_0 = arith.constant 0 : index
    %c0_1 = arith.constant 0 : index
    %0 = vector.load %arg1[%c0, %c0_0, %c0_1] : memref<1x4x256xf32, #tpu.memory_space<vmem>>, vector<1x4x256xf32>
    %1 = vector.shape_cast %0 : vector<1x4x256xf32> to vector<4x256xf32>
    %c0_2 = arith.constant 0 : index
    %c0_3 = arith.constant 0 : index
    %2 = vector.load %arg2[%c0_2, %c0_3] : memref<24x4xf32, #tpu.memory_space<vmem>>, vector<24x4xf32>
    %cst = arith.constant dense<0.000000e+00> : vector<24x256xf32>
    %3 = tpu.matmul %2, %1, %cst {dimension_numbers = #tpu.dot_dimension_numbers<[1], [0], [0], [1], [0, 0, 1, 1], [], []>} : vector<24x4xf32>, vector<4x256xf32>, vector<24x256xf32> -> vector<24x256xf32>
    %c0_4 = arith.constant 0 : index
    %c9 = arith.constant 9 : index
    %4 = vector.load %arg3[%c0_4, %c9] : memref<24x12xf32, #tpu.memory_space<vmem>>, vector<24x1xf32>
    %5 = vector.broadcast %4 : vector<24x1xf32> to vector<24x256xf32>
    %6 = arith.addf %3, %5 : vector<24x256xf32>
    %cst_5 = arith.constant 0.000000e+00 : f32
    %cst_6 = arith.constant 6.000000e+00 : f32
    %7 = vector.broadcast %cst_5 : f32 to vector<24x256xf32>
    %8 = arith.maximumf %7, %6 : vector<24x256xf32>
    %9 = vector.broadcast %cst_6 : f32 to vector<24x256xf32>
    %10 = arith.minimumf %9, %8 : vector<24x256xf32>
    %c17_i32 = arith.constant 17 : i32
    %11 = tpu.dynamic_rotate %10 by %c17_i32 dim 1 : vector<24x256xf32>, i32 -> vector<24x256xf32>
    %c0_7 = arith.constant 0 : index
    %c0_8 = arith.constant 0 : index
    %12 = vector.load %arg4[%c0_7, %c0_8] : memref<9x256xf32, #tpu.memory_space<vmem>>, vector<1x256xf32>
    %13 = vector.broadcast %12 : vector<1x256xf32> to vector<24x256xf32>
    %14 = arith.mulf %11, %13 : vector<24x256xf32>
    %c0_9 = arith.constant 0 : index
    %c0_10 = arith.constant 0 : index
    %15 = vector.load %arg3[%c0_9, %c0_10] : memref<24x12xf32, #tpu.memory_space<vmem>>, vector<24x1xf32>
    %16 = vector.broadcast %15 : vector<24x1xf32> to vector<24x256xf32>
    %17 = arith.mulf %14, %16 : vector<24x256xf32>
    %c16_i32 = arith.constant 16 : i32
    %18 = tpu.dynamic_rotate %10 by %c16_i32 dim 1 : vector<24x256xf32>, i32 -> vector<24x256xf32>
    %c1 = arith.constant 1 : index
    %c0_11 = arith.constant 0 : index
    %19 = vector.load %arg4[%c1, %c0_11] : memref<9x256xf32, #tpu.memory_space<vmem>>, vector<1x256xf32>
    %20 = vector.broadcast %19 : vector<1x256xf32> to vector<24x256xf32>
    %21 = arith.mulf %18, %20 : vector<24x256xf32>
    %c0_12 = arith.constant 0 : index
    %c1_13 = arith.constant 1 : index
    %22 = vector.load %arg3[%c0_12, %c1_13] : memref<24x12xf32, #tpu.memory_space<vmem>>, vector<24x1xf32>
    %23 = vector.broadcast %22 : vector<24x1xf32> to vector<24x256xf32>
    %24 = arith.mulf %21, %23 : vector<24x256xf32>
    %25 = arith.addf %17, %24 : vector<24x256xf32>
    %c15_i32 = arith.constant 15 : i32
    %26 = tpu.dynamic_rotate %10 by %c15_i32 dim 1 : vector<24x256xf32>, i32 -> vector<24x256xf32>
    %c2 = arith.constant 2 : index
    %c0_14 = arith.constant 0 : index
    %27 = vector.load %arg4[%c2, %c0_14] : memref<9x256xf32, #tpu.memory_space<vmem>>, vector<1x256xf32>
    %28 = vector.broadcast %27 : vector<1x256xf32> to vector<24x256xf32>
    %29 = arith.mulf %26, %28 : vector<24x256xf32>
    %c0_15 = arith.constant 0 : index
    %c2_16 = arith.constant 2 : index
    %30 = vector.load %arg3[%c0_15, %c2_16] : memref<24x12xf32, #tpu.memory_space<vmem>>, vector<24x1xf32>
    %31 = vector.broadcast %30 : vector<24x1xf32> to vector<24x256xf32>
    %32 = arith.mulf %29, %31 : vector<24x256xf32>
    %33 = arith.addf %25, %32 : vector<24x256xf32>
    %c1_i32 = arith.constant 1 : i32
    %34 = tpu.dynamic_rotate %10 by %c1_i32 dim 1 : vector<24x256xf32>, i32 -> vector<24x256xf32>
    %c3 = arith.constant 3 : index
    %c0_17 = arith.constant 0 : index
    %35 = vector.load %arg4[%c3, %c0_17] : memref<9x256xf32, #tpu.memory_space<vmem>>, vector<1x256xf32>
    %36 = vector.broadcast %35 : vector<1x256xf32> to vector<24x256xf32>
    %37 = arith.mulf %34, %36 : vector<24x256xf32>
    %c0_18 = arith.constant 0 : index
    %c3_19 = arith.constant 3 : index
    %38 = vector.load %arg3[%c0_18, %c3_19] : memref<24x12xf32, #tpu.memory_space<vmem>>, vector<24x1xf32>
    %39 = vector.broadcast %38 : vector<24x1xf32> to vector<24x256xf32>
    %40 = arith.mulf %37, %39 : vector<24x256xf32>
    %41 = arith.addf %33, %40 : vector<24x256xf32>
    %c0_20 = arith.constant 0 : index
    %c4 = arith.constant 4 : index
    %42 = vector.load %arg3[%c0_20, %c4] : memref<24x12xf32, #tpu.memory_space<vmem>>, vector<24x1xf32>
    %43 = vector.broadcast %42 : vector<24x1xf32> to vector<24x256xf32>
    %44 = arith.mulf %10, %43 : vector<24x256xf32>
    %45 = arith.addf %41, %44 : vector<24x256xf32>
    %c255_i32 = arith.constant 255 : i32
    %46 = tpu.dynamic_rotate %10 by %c255_i32 dim 1 : vector<24x256xf32>, i32 -> vector<24x256xf32>
    %c5 = arith.constant 5 : index
    %c0_21 = arith.constant 0 : index
    %47 = vector.load %arg4[%c5, %c0_21] : memref<9x256xf32, #tpu.memory_space<vmem>>, vector<1x256xf32>
    %48 = vector.broadcast %47 : vector<1x256xf32> to vector<24x256xf32>
    %49 = arith.mulf %46, %48 : vector<24x256xf32>
    %c0_22 = arith.constant 0 : index
    %c5_23 = arith.constant 5 : index
    %50 = vector.load %arg3[%c0_22, %c5_23] : memref<24x12xf32, #tpu.memory_space<vmem>>, vector<24x1xf32>
    %51 = vector.broadcast %50 : vector<24x1xf32> to vector<24x256xf32>
    %52 = arith.mulf %49, %51 : vector<24x256xf32>
    %53 = arith.addf %45, %52 : vector<24x256xf32>
    %c241_i32 = arith.constant 241 : i32
    %54 = tpu.dynamic_rotate %10 by %c241_i32 dim 1 : vector<24x256xf32>, i32 -> vector<24x256xf32>
    %c6 = arith.constant 6 : index
    %c0_24 = arith.constant 0 : index
    %55 = vector.load %arg4[%c6, %c0_24] : memref<9x256xf32, #tpu.memory_space<vmem>>, vector<1x256xf32>
    %56 = vector.broadcast %55 : vector<1x256xf32> to vector<24x256xf32>
    %57 = arith.mulf %54, %56 : vector<24x256xf32>
    %c0_25 = arith.constant 0 : index
    %c6_26 = arith.constant 6 : index
    %58 = vector.load %arg3[%c0_25, %c6_26] : memref<24x12xf32, #tpu.memory_space<vmem>>, vector<24x1xf32>
    %59 = vector.broadcast %58 : vector<24x1xf32> to vector<24x256xf32>
    %60 = arith.mulf %57, %59 : vector<24x256xf32>
    %61 = arith.addf %53, %60 : vector<24x256xf32>
    %c240_i32 = arith.constant 240 : i32
    %62 = tpu.dynamic_rotate %10 by %c240_i32 dim 1 : vector<24x256xf32>, i32 -> vector<24x256xf32>
    %c7 = arith.constant 7 : index
    %c0_27 = arith.constant 0 : index
    %63 = vector.load %arg4[%c7, %c0_27] : memref<9x256xf32, #tpu.memory_space<vmem>>, vector<1x256xf32>
    %64 = vector.broadcast %63 : vector<1x256xf32> to vector<24x256xf32>
    %65 = arith.mulf %62, %64 : vector<24x256xf32>
    %c0_28 = arith.constant 0 : index
    %c7_29 = arith.constant 7 : index
    %66 = vector.load %arg3[%c0_28, %c7_29] : memref<24x12xf32, #tpu.memory_space<vmem>>, vector<24x1xf32>
    %67 = vector.broadcast %66 : vector<24x1xf32> to vector<24x256xf32>
    %68 = arith.mulf %65, %67 : vector<24x256xf32>
    %69 = arith.addf %61, %68 : vector<24x256xf32>
    %c239_i32 = arith.constant 239 : i32
    %70 = tpu.dynamic_rotate %10 by %c239_i32 dim 1 : vector<24x256xf32>, i32 -> vector<24x256xf32>
    %c8 = arith.constant 8 : index
    %c0_30 = arith.constant 0 : index
    %71 = vector.load %arg4[%c8, %c0_30] : memref<9x256xf32, #tpu.memory_space<vmem>>, vector<1x256xf32>
    %72 = vector.broadcast %71 : vector<1x256xf32> to vector<24x256xf32>
    %73 = arith.mulf %70, %72 : vector<24x256xf32>
    %c0_31 = arith.constant 0 : index
    %c8_32 = arith.constant 8 : index
    %74 = vector.load %arg3[%c0_31, %c8_32] : memref<24x12xf32, #tpu.memory_space<vmem>>, vector<24x1xf32>
    %75 = vector.broadcast %74 : vector<24x1xf32> to vector<24x256xf32>
    %76 = arith.mulf %73, %75 : vector<24x256xf32>
    %77 = arith.addf %69, %76 : vector<24x256xf32>
    %c0_33 = arith.constant 0 : index
    %c10 = arith.constant 10 : index
    %78 = vector.load %arg3[%c0_33, %c10] : memref<24x12xf32, #tpu.memory_space<vmem>>, vector<24x1xf32>
    %79 = vector.broadcast %78 : vector<24x1xf32> to vector<24x256xf32>
    %80 = arith.addf %77, %79 : vector<24x256xf32>
    %cst_34 = arith.constant 0.000000e+00 : f32
    %cst_35 = arith.constant 6.000000e+00 : f32
    %81 = vector.broadcast %cst_34 : f32 to vector<24x256xf32>
    %82 = arith.maximumf %81, %80 : vector<24x256xf32>
    %83 = vector.broadcast %cst_35 : f32 to vector<24x256xf32>
    %84 = arith.minimumf %83, %82 : vector<24x256xf32>
    %c0_36 = arith.constant 0 : index
    %c0_37 = arith.constant 0 : index
    %85 = vector.load %arg5[%c0_36, %c0_37] : memref<8x24xf32, #tpu.memory_space<vmem>>, vector<8x24xf32>
    %cst_38 = arith.constant dense<0.000000e+00> : vector<8x256xf32>
    %86 = tpu.matmul %85, %84, %cst_38 {dimension_numbers = #tpu.dot_dimension_numbers<[1], [0], [0], [1], [0, 0, 1, 1], [], []>} : vector<8x24xf32>, vector<24x256xf32>, vector<8x256xf32> -> vector<8x256xf32>
    %c0_39 = arith.constant 0 : index
    %c11 = arith.constant 11 : index
    %87 = vector.load %arg3[%c0_39, %c11] : memref<24x12xf32, #tpu.memory_space<vmem>>, vector<8x1xf32>
    %88 = vector.broadcast %87 : vector<8x1xf32> to vector<8x256xf32>
    %89 = arith.addf %86, %88 : vector<8x256xf32>
    %c0_40 = arith.constant 0 : index
    %c0_41 = arith.constant 0 : index
    %c0_42 = arith.constant 0 : index
    %90 = vector.load %arg6[%c0_40, %c0_41, %c0_42] : memref<1x8x256xf32, #tpu.memory_space<vmem>>, vector<1x8x256xf32>
    %91 = vector.shape_cast %90 : vector<1x8x256xf32> to vector<8x256xf32>
    %92 = vector.shape_cast %89 : vector<8x256xf32> to vector<1x8x256xf32>
    tpu.vector_store %arg6[%c0_40, %c0_41, %c0_42], %92 {strides = array<i32>} : memref<1x8x256xf32, #tpu.memory_space<vmem>>, vector<1x8x256xf32>,
    return
  }
  func.func @transform_0(%arg0: i32) -> (i32, i32, i32) {
    %c0_i32 = arith.constant 0 : i32
    %c0_i32_0 = arith.constant 0 : i32
    %c0_i32_1 = arith.constant 0 : i32
    return %arg0, %c0_i32, %c0_i32_0 : i32, i32, i32
  }
  func.func @transform_1(%arg0: i32) -> (i32, i32) {
    %c0_i32 = arith.constant 0 : i32
    %c0_i32_0 = arith.constant 0 : i32
    %c0_i32_1 = arith.constant 0 : i32
    return %c0_i32, %c0_i32_0 : i32, i32
  }
  func.func @transform_2(%arg0: i32) -> (i32, i32) {
    %c0_i32 = arith.constant 0 : i32
    %c0_i32_0 = arith.constant 0 : i32
    %c0_i32_1 = arith.constant 0 : i32
    return %c0_i32, %c0_i32_0 : i32, i32
  }
  func.func @transform_3(%arg0: i32) -> (i32, i32) {
    %c0_i32 = arith.constant 0 : i32
    %c0_i32_0 = arith.constant 0 : i32
    %c0_i32_1 = arith.constant 0 : i32
    return %c0_i32, %c0_i32_0 : i32, i32
  }
  func.func @transform_4(%arg0: i32) -> (i32, i32) {
    %c0_i32 = arith.constant 0 : i32
    %c0_i32_0 = arith.constant 0 : i32
    %c0_i32_1 = arith.constant 0 : i32
    return %c0_i32, %c0_i32_0 : i32, i32
  }
  func.func @transform_5(%arg0: i32) -> (i32, i32, i32) {
    %c0_i32 = arith.constant 0 : i32
    %c0_i32_0 = arith.constant 0 : i32
    %c0_i32_1 = arith.constant 0 : i32
    return %arg0, %c0_i32, %c0_i32_0 : i32, i32, i32
  }
}

</mosaic_0001>

<bundles_post_ra>
// kernel: tpu_custom_call.1
= control target key start
LH: loop header
LB: loop body
LE: loop exit
PB: predicated region body
PF: predicated region fallthrough
CT: control target
= control target key end

     0   :  { %10 = vsyncpa [#allocation3], 0  ;;  %s1936_s0 = inlined_call_operand.vmem [shape: f32[2,4,256], index: 0, kind: input, shape index: {}]   ;;  %s1937_s1 = inlined_call_operand.vmem [shape: f32[24,4], index: 1, kind: input, shape index: {}]   ;;  %s1938_s2 = inlined_call_operand.vmem [shape: f32[24,12], index: 2, kind: input, shape index: {}]   ;;  %s1939_s3 = inlined_call_operand.vmem [shape: f32[9,256], index: 3, kind: input, shape index: {}]   ;;  %s1940_s4 = inlined_call_operand.vmem [shape: f32[8,24], index: 4, kind: input, shape index: {}]   ;;  %s1941_s5 = inlined_call_operand.hbm [shape: f32[2,8,256], index: 5, kind: output, shape index: {}]  }
   0x1   :  { %12 = vsyncpa [#allocation3 + $0x1], 0  ;;  %s1297_s18 = smov 0   ;;  %s1299_s19 = smov 0  }
   0x2   :  { %s1301_s20 = smov 0   ;;  %s1303_s21 = smov 0  }
   0x3 LB: > { %s1318_s22 = sadd.s32 4294967295, %s1243_s21   ;;  %s1066_s23 = sadd.s32 4294967294, %s1243_s21   ;;  %s1243_s21 = sphi %s1303_s21, %s1974_s21   ;;  %s1239_s20 = sphi %s1301_s20, %s1973_s20   ;;  %s1235_s19 = sphi %s1299_s19, %s1972_s19   ;;  %s1231_s18 = sphi %s1297_s18, %s1971_s18  }
   0x4   : > { %s1322_s24 = sadd.s32 1, %s1243_s21   ;;  %s135_s25 = sadd.s32 1, %s1239_s20 }
   0x5   : > { %s132_s26 = ssub.s32 %s1243_s21, %s1322_s24  ;;  %p145_p0 = scmp.ne.s32.totalorder %s1239_s20, %s1235_s19 }
   0x6   : > { %p133_p1 = scmp.eq.s32.totalorder %s132_s26, 0  ;;  %p146_p2 = scmp.eq.s32.totalorder %s1318_s22, 1 }
   0x7   : > { %p151_p3 = scmp.ne.s32.totalorder %s1235_s19, %s1231_s18  ;;  %p152_p4 = scmp.eq.s32.totalorder %s1066_s23, 1 }
   0x8   : > { %s1333_s27 = scalar_select %p133_p1, %s1239_s20, %s135_s25  }
   0x9   : > { %p1335_p5 = por %p146_p2, %p145_p0  ;;  %p1339_p6 = por %p152_p4, %p151_p3 }
   0xa   : > { %p1069_p7 = scmp.ge.s32.totalorder %s1243_s21, 1  ;;  %p190_p8 = scmp.lt.s32.totalorder %s1243_s21, 3 }
   0xc   : > { %p191_p9 = pnand %p1069_p7, %p190_p8 }
   0xe   : > { %194 = sbr.rel (%p191_p9) target bundleno = 694 (0x2b6), region = 40 }
  0x13   : > { %p218_p10 = scmp.lt.s32.totalorder %s1318_s22, 1  ;;  %v1245_v0 = vmov 0.0   ;;  %v1349_v1 = vld [vmem:[%s1938_s2] sm:$0xff]  ;;  %v1246_v2 = vmov 9   ;;  %v1355_v3 = vld [vmem:[%s1938_s2 + $0x10] sm:$0xff]  ;;  %vm257_vm0 = vcmask 1043456  }
  0x14   : > { %326 = vmatprep.mubr.f32.mxu0 %v1245_v0  ;;  %983 = vmatprep.mubr.f32.mxu1 %v1245_v0  ;;  %v1365_v5 = vld [vmem:[%s1938_s2 + $0x8] sm:$0xff]  ;;  %v1247_v7 = vmov 0   ;;  %v224_v8 = vld [vmem:[%s1937_s1] sm:$0xff]  ;;  %vm247_vm1 = vcmask 31744   ;;  %v1248_v10 = vmov 2   ;;  %v226_v11 = vld [vmem:[%s1937_s1 + $0x10] sm:$0xff] }
  0x15   : > { %s219_s7 = scalar_select %p218_p10, %s1318_s22, 1  ;;  %1154 = vset.pattern.permute.xlu1 %v1246_v2  ;;  %1153 = vset.pattern.permute.xlu0 %v1246_v2  ;;  %v225_v9 = vld [vmem:[%s1937_s1 + $0x8] sm:$0xff]  ;;  %v1249_v12 = vmov 1   ;;  %v1250_v13 = vmov 4   ;;  %v1251_v14 = vmov 3   ;;  %v1252_v15 = vmov 5  }
  0x16   : > { %232 = vperm.xlu1 %1154, %v1349_v1   ;;  %242 = vperm.xlu0 %1153, %v1355_v3   ;;  %v1253_v16 = vmov 6   ;;  %v1254_v17 = vmov 7   ;;  %v1255_v18 = vmov 8   ;;  %v1256_v20 = vmov 10   ;;  %s1257_s6 = smov 16   ;;  %s1259_s8 = smov 15  }
  0x17   : > { %s1091_s10 = sshll.u32 %s219_s7, 3  ;;  %s1258_s7 = smov 17   ;;  %vm915_vm10 = vcmask 195584  }
  0x18   : > { %s222_s13 = scalar_lea.vmem %s1936_s0, %s1091_s10  ;;  %s1260_s9 = smov 1  }
  0x19   : > { %v223_v4 = vld [vmem:[%s222_s13] sm:$0xff]  ;;  %s1261_s10 = smov 127   ;;  %s1262_s11 = smov 113  }
  0x1a   : > { %v246_v6 = vcombine.high %v223_v4, %v223_v4  ;;  %1155 = vset.pattern.permute.xlu1 %v1247_v7  ;;  %237 = vperm.xlu0 %1153, %v1365_v5   ;;  %s1263_s12 = smov 112   ;;  %s1264_s13 = smov 111  }
  0x1b   : > { %411 = vperm.xlu1 %1155, %v1355_v3   ;;  %s215_s16 = sand.u32 1, %s1235_s19   ;;  %s1092_s23 = sshll.u32 %s1318_s22, 8 }
  0x1c   : > { %1073 = vmatprep.subr.msk.mxu0 %vm257_vm0, %v246_v6  ;;  %s1070_s17 = sshll.u32 %s215_s16, 4 }
  0x1d   : > { %1074 = vmatpush1.msk.msra.mxu0 %vm257_vm0, %v223_v4  ;;  %s217_s25 = scalar_lea.vmem [#allocation2], %s1070_s17 }
  0x1e   : > { %1075 = vmatmul.mubr.msk.f32.vlgmr.msra.gmra.mxu0 %vm247_vm1, %v224_v8  ;;  %1156 = vset.pattern.permute.xlu0 %v1247_v7  ;;  %s1007_s26 = sshll.u32 %s217_s25, 4  ;;  %s1008_s26 = int_to_ptr.vmem [resolvable:$true] %s1007_s26 }
  0x1f   : > { %332 = vmatprep.mubr.f32.mxu0 %v1245_v0  ;;  %1158 = vset.pattern.permute.xlu1 %v1248_v10 }
  0x20   : > { %529 = vperm.xlu1 %1158, %v1355_v3   ;;  %406 = vperm.xlu0 %1156, %v1365_v5  }
  0x22   : > { %1076 = vmatmul.mubr.msk.f32.gmra.mxu0 %vm247_vm1, %v225_v9 }
  0x23   : > { %338 = vmatprep.mubr.f32.mxu0 %v1245_v0 }
  0x24   : > { %1159 = vset.pattern.permute.xlu1 %v1247_v7  ;;  %1157 = vset.pattern.permute.xlu0 %v1249_v12  ;;  %v369_v12 = vlaneseq }
  0x25   : > { %401 = vperm.xlu1 %1159, %v1349_v1   ;;  %467 = vperm.xlu0 %1157, %v1355_v3  }
  0x26   : > { %1077 = vmatmul.mubr.msk.f32.gmra.mxu0 %vm247_vm1, %v226_v11 }
  0x29   : > { %1160 = vset.pattern.permute.xlu1 %v1248_v10  ;;  %463 = vperm.xlu0 %1157, %v1365_v5  }
  0x2a   : > { %525 = vperm.xlu1 %1160, %v1365_v5  }
  0x2d   : > { %459 = vperm.xlu0 %1157, %v1349_v1  }
  0x2e   : > { %1163 = vset.pattern.permute.xlu1 %v1250_v13 }
  0x2f   : > { %615 = vperm.xlu1 %1163, %v1355_v3  }
  0x31   : > { %1161 = vset.pattern.permute.xlu0 %v1248_v10 }
  0x32   : > { %521 = vperm.xlu0 %1161, %v1349_v1  }
  0x33   : > { %1164 = vset.pattern.permute.xlu1 %v1251_v14 }
  0x34   : > { %583 = vperm.xlu1 %1164, %v1349_v1  }
  0x36   : > { %1162 = vset.pattern.permute.xlu0 %v1251_v14 }
  0x37   : > { %591 = vperm.xlu0 %1162, %v1355_v3  }
  0x38   : > { %1166 = vset.pattern.permute.xlu1 %v1252_v15 }
  0x39   : > { %677 = vperm.xlu1 %1166, %v1355_v3  }
  0x3b   : > { %587 = vperm.xlu0 %1162, %v1365_v5  }
  0x3d   : > { %1167 = vset.pattern.permute.xlu1 %v1250_v13 }
  0x3e   : > { %607 = vperm.xlu1 %1167, %v1349_v1  }
  0x3f   : > { %1165 = vset.pattern.permute.xlu0 %v1250_v13  ;;  %v1555_v13 = vand.u32 127, %v369_v12 }
  0x40   : > { %611 = vperm.xlu0 %1165, %v1365_v5  }
  0x41   : > { %vm494_vm2 = vcmp.lt.s32.totalorder %v1555_v13, 15  ;;  %vm556_vm3 = vcmp.lt.s32.totalorder %v1555_v13, 1  ;;  %vm642_vm4 = vcmp.lt.s32.totalorder %v1555_v13, 127  ;;  %vm704_vm5 = vcmp.lt.s32.totalorder %v1555_v13, 113 }
  0x42   : > { %1169 = vset.pattern.permute.xlu1 %v1253_v16  ;;  %vm371_vm6 = vcmp.lt.s32.totalorder %v1555_v13, 17  ;;  %vm432_vm7 = vcmp.lt.s32.totalorder %v1555_v13, 16  ;;  %vm766_vm8 = vcmp.lt.s32.totalorder %v1555_v13, 112  ;;  %vm828_vm9 = vcmp.lt.s32.totalorder %v1555_v13, 111 }
  0x43   : > { %739 = vperm.xlu1 %1169, %v1355_v3  }
  0x44   : > { %1168 = vset.pattern.permute.xlu0 %v1252_v15 }
  0x45   : > { %673 = vperm.xlu0 %1168, %v1365_v5  }
  0x47   : > { %1170 = vset.pattern.permute.xlu1 %v1252_v15 }
  0x48   : > { %669 = vperm.xlu1 %1170, %v1349_v1  }
  0x49   : > { %1171 = vset.pattern.permute.xlu0 %v1253_v16 }
  0x4a   : > { %735 = vperm.xlu0 %1171, %v1365_v5  }
  0x4c   : > { %1172 = vset.pattern.permute.xlu1 %v1254_v17 }
  0x4d   : > { %801 = vperm.xlu1 %1172, %v1355_v3  }
  0x4e   : > { %1174 = vset.pattern.permute.xlu0 %v1254_v17 }
  0x4f   : > { %797 = vperm.xlu0 %1174, %v1365_v5  }
  0x51   : > { %1173 = vset.pattern.permute.xlu1 %v1253_v16 }
  0x52   : > { %731 = vperm.xlu1 %1173, %v1349_v1  }
  0x53   : > { %1177 = vset.pattern.permute.xlu0 %v1255_v18 }
  0x54   : > { %859 = vperm.xlu0 %1177, %v1365_v5  }
  0x56   : > { %1175 = vset.pattern.permute.xlu1 %v1255_v18 }
  0x57   : > { %863 = vperm.xlu1 %1175, %v1355_v3  }
  0x5b   : > { %1176 = vset.pattern.permute.xlu1 %v1254_v17 }
  0x5c   : > { %793 = vperm.xlu1 %1176, %v1349_v1  }
  0x60   : > { %1178 = vset.pattern.permute.xlu1 %v1256_v20 }
  0x91   : > { %v1406_v19 = vpop.permute.xlu0 %242  ;;  %v233_v28 = vpop.permute.xlu1 %232 }
  0x95   : > { %v238_v21 = vpop.permute.xlu0 %237 }
  0x96   : > { %v1460_v49 = vpop.permute.xlu1 %411 }
  0x9b   : > { %v1409_v22 = vpop.permute.xlu0 %406  ;;  %v1467_v50 = vpop.permute.xlu1 %529 }
  0xa0   : > { %v1411_v23 = vpop.permute.xlu0 %467  ;;  %v1472_v53 = vpop.permute.xlu1 %401 }
  0xa4   : > { %v1413_v24 = vpop.permute.xlu0 %463 }
  0xa5   : > { %v1478_v55 = vpop.permute.xlu1 %525 }
  0xa8   : > { %v1415_v25 = vpop.permute.xlu0 %459 }
  0xaa   : > { %v1485_v58 = vpop.permute.xlu1 %615 }
  0xad   : > { %v1417_v26 = vpop.permute.xlu0 %521 }
  0xaf   : > { %v1494_v60 = vpop.permute.xlu1 %583 }
  0xb2   : > { %v1419_v27 = vpop.permute.xlu0 %591 }
  0xb4   : > { %v1501_v63 = vpop.permute.xlu1 %677 }
  0xb5   : > { %1953 = vst [vmem:[#allocation5_spill] sm:$0xff] %v1501_v63 }
  0xb6   : > { %v1421_v32 = vpop.permute.xlu0 %587 }
  0xb9   : > { %v1510_v0 = vpop.permute.xlu1 %607 }
  0xbb   : > { %v612_v42 = vpop.permute.xlu0 %611 }
  0xbe   : > { %v1517_v2 = vpop.permute.xlu1 %739 }
  0xbf   : > { %1954 = vst [vmem:[#allocation6_spill] sm:$0xff] %v1517_v2 }
  0xc0   : > { %v1528_v6 = vpop.permute.xlu0 %673 }
  0xc3   : > { %v1524_v4 = vpop.permute.xlu1 %669 }
  0xc8   : > { %v1530_v7 = vpop.permute.xlu1 %801 }
  0xc9   : > { %1955 = vst [vmem:[#allocation7_spill] sm:$0xff] %v1530_v7 }
  0xcd   : > { %v1537_v8 = vpop.permute.xlu1 %731 }
  0xd2   : > { %v1543_v10 = vpop.permute.xlu1 %863 }
  0xd3   : > { %1958 = vst [vmem:[#allocation10_spill] sm:$0xff] %v1543_v10 }
  0xd7   : > { %v1551_v11 = vpop.permute.xlu1 %793 }
  0xde   : > { %v328_v29 = vpop.f32.mrf.mxu0 }
  0xdf   : > { %v329_v30 = vadd.f32 %v328_v29, %v233_v28 }
  0xe0   : > { %v330_v31 = vpop.f32.mrf.mxu0 }
  0xe1   : > { %v345_v33 = vmax.f32 %v329_v30, 0.0  ;;  %v331_v34 = vadd.f32 %v330_v31, %v233_v28 }
  0xe2   : > { %v334_v35 = vpop.f32.mrf.mxu0 }
  0xe3   : > { %v1423_v36 = vmin.f32 %v345_v33, 6.0  ;;  %v346_v37 = vmax.f32 %v331_v34, 0.0  ;;  %v335_v38 = vadd.f32 %v334_v35, %v238_v21  ;;  %v1265_v35 = vmov 11  }
  0xe4   : > { %v336_v39 = vpop.f32.mrf.mxu0 }
  0xe5   : > { %420 = vrot.lane.b32.xlu0 %v1423_v36, %s1257_s6  ;;  %357 = vrot.lane.b32.xlu1 %v1423_v36, %s1258_s7  ;;  %v347_v40 = vmax.f32 %v335_v38, 0.0  ;;  %v337_v41 = vadd.f32 %v336_v39, %v238_v21  ;;  %v1429_v43 = vmin.f32 %v346_v37, 6.0  ;;  %v381_v39 = vshrl.u32 %v369_v12, 7 }
  0xe6   : > { %v340_v51 = vpop.f32.mrf.mxu0 }
  0xe7   : > { %v353_v44 = vmin.f32 %v347_v40, 6.0  ;;  %v348_v45 = vmax.f32 %v337_v41, 0.0  ;;  %v341_v52 = vadd.f32 %v340_v51, %v1406_v19  ;;  %v1078_v51 = vld [vmem:[%s1939_s3 + $0x1] ss:$8 sm:$0x3] }
  0xe8   : > { %v342_v57 = vpop.f32.mrf.mxu0 }
  0xe9   : > { %488 = vrot.lane.b32.xlu0 %v1429_v43, %s1259_s8  ;;  %482 = vrot.lane.b32.xlu1 %v1423_v36, %s1259_s8  ;;  %v354_v46 = vmin.f32 %v348_v45, 6.0  ;;  %v1435_v47 = vmul.f32 %v612_v42, %v353_v44  ;;  %v349_v54 = vmax.f32 %v341_v52, 0.0  ;;  %v343_v59 = vadd.f32 %v342_v57, %v1406_v19  ;;  %v1080_v52 = vld [vmem:[%s1939_s3 + $0x3] ss:$8 sm:$0x3] }
  0xea   : > { %v1593_v45 = vsub.s32 1, %v381_v39 }
  0xeb   : > { %v1437_v48 = vmul.f32 %v612_v42, %v354_v46  ;;  %v1480_v56 = vmin.f32 %v349_v54, 6.0  ;;  %v350_v61 = vmax.f32 %v343_v59, 0.0  ;;  %v1081_v54 = vld [vmem:[%s1939_s3 + $0x5] ss:$8 sm:$0x3] }
  0xec   : > { %1961 = vst [vmem:[#allocation13_spill] sm:$0xff] %v1593_v45 }
  0xed   : > { %550 = vrot.lane.b32.xlu0 %v1429_v43, %s1260_s9  ;;  %544 = vrot.lane.b32.xlu1 %v1423_v36, %s1260_s9  ;;  %v1499_v62 = vmin.f32 %v350_v61, 6.0 }
  0xf1   : > { %636 = vrot.lane.b32.xlu0 %v1429_v43, %s1261_s10  ;;  %630 = vrot.lane.b32.xlu1 %v1423_v36, %s1261_s10 }
  0xf5   : > { %698 = vrot.lane.b32.xlu0 %v1429_v43, %s1262_s11  ;;  %692 = vrot.lane.b32.xlu1 %v1423_v36, %s1262_s11 }
  0xf9   : > { %422 = vrot.lane.b32.xlu0 %v353_v44, %s1257_s6  ;;  %754 = vrot.lane.b32.xlu1 %v1423_v36, %s1263_s12 }
  0xfd   : > { %484 = vrot.lane.b32.xlu0 %v353_v44, %s1259_s8  ;;  %363 = vrot.lane.b32.xlu1 %v1429_v43, %s1258_s7 }
 0x101   : > { %818 = vrot.lane.b32.xlu0 %v353_v44, %s1264_s13  ;;  %426 = vrot.lane.b32.xlu1 %v1429_v43, %s1257_s6 }
 0x105   : > { %365 = vrot.lane.b32.xlu0 %v354_v46, %s1258_s7  ;;  %760 = vrot.lane.b32.xlu1 %v1429_v43, %s1263_s12 }
 0x109   : > { %552 = vrot.lane.b32.xlu0 %v354_v46, %s1260_s9  ;;  %359 = vrot.lane.b32.xlu1 %v353_v44, %s1258_s7 }
 0x10d   : > { %638 = vrot.lane.b32.xlu0 %v354_v46, %s1261_s10  ;;  %546 = vrot.lane.b32.xlu1 %v353_v44, %s1260_s9 }
 0x111   : > { %700 = vrot.lane.b32.xlu0 %v354_v46, %s1262_s11  ;;  %632 = vrot.lane.b32.xlu1 %v353_v44, %s1261_s10 }
 0x115   : > { %762 = vrot.lane.b32.xlu0 %v354_v46, %s1263_s12  ;;  %694 = vrot.lane.b32.xlu1 %v353_v44, %s1262_s11 }
 0x119   : > { %634 = vrot.lane.b32.xlu0 %v1480_v56, %s1261_s10  ;;  %756 = vrot.lane.b32.xlu1 %v353_v44, %s1263_s12  ;;  %v1591_v44 = vsub.s32 0, %v381_v39  ;;  %v1082_v39 = vld [vmem:[%s1939_s3 + $0x6] ss:$8 sm:$0x3] }
 0x11b   : > { %1960 = vst [vmem:[#allocation12_spill] sm:$0xff] %v1591_v44  ;;  %v1676_v63 = vrot.slane %v1082_v39, %v1591_v44 }
 0x11d   : > { %696 = vrot.lane.b32.xlu0 %v1480_v56, %s1262_s11  ;;  %428 = vrot.lane.b32.xlu1 %v354_v46, %s1257_s6 }
 0x121   : > { %758 = vrot.lane.b32.xlu0 %v1480_v56, %s1263_s12  ;;  %490 = vrot.lane.b32.xlu1 %v354_v46, %s1259_s8 }
 0x125   : > { %820 = vrot.lane.b32.xlu0 %v1480_v56, %s1264_s13  ;;  %824 = vrot.lane.b32.xlu1 %v354_v46, %s1264_s13  ;;  %v1079_v46 = vld [vmem:[%s1939_s3 + $0x2] ss:$8 sm:$0x3] }
 0x126   : > { %v1618_v12 = vrot.slane %v1079_v46, %v1591_v44 }
 0x129   : > { %492 = vrot.lane.b32.xlu0 %v1499_v62, %s1259_s8  ;;  %361 = vrot.lane.b32.xlu1 %v1480_v56, %s1258_s7 }
 0x12d   : > { %855 = vperm.xlu0 %1177, %v1349_v1   ;;  %424 = vrot.lane.b32.xlu1 %v1480_v56, %s1257_s6 }
 0x131   : > { %816 = vrot.lane.b32.xlu0 %v1423_v36, %s1264_s13  ;;  %486 = vrot.lane.b32.xlu1 %v1480_v56, %s1259_s8  ;;  %s993_s8 = scalar_lea.sflag [#allocation3], %s215_s16 }
 0x132   : > { %1179 = vset.pattern.permute.xlu0 %v1256_v20 }
 0x135   : > { %883 = vperm.xlu0 %1179, %v1365_v5   ;;  %548 = vrot.lane.b32.xlu1 %v1480_v56, %s1260_s9  ;;  %v1535_v5 = vpop.permute.xlu0 %735 }
 0x136   : > { %1956 = vst [vmem:[#allocation8_spill] sm:$0xff] %v1535_v5 }
 0x139   : > { %367 = vrot.lane.b32.xlu1 %v1499_v62, %s1258_s7  ;;  %v1541_v9 = vpop.permute.xlu0 %797  ;;  %1181 = vset.pattern.permute.xlu0 %v1265_v35  ;;  %s1005_s7 = scalar_lea.hbm %s1941_s5, %s1092_s23 }
 0x13a   : > { %1957 = vst [vmem:[#allocation9_spill] sm:$0xff] %v1541_v9  ;;  %v1679_v9 = vrot.slane %v1082_v39, %v1593_v45 }
 0x13d   : > { %430 = vrot.lane.b32.xlu1 %v1499_v62, %s1257_s6 }
 0x141   : > { %887 = vperm.xlu1 %1178, %v1355_v3   ;;  %v1549_v3 = vpop.permute.xlu0 %859 }
 0x142   : > { %1959 = vst [vmem:[#allocation11_spill] sm:$0xff] %v1549_v3 }
 0x145   : > { %554 = vrot.lane.b32.xlu1 %v1499_v62, %s1260_s9  ;;  %s1183_s9 = scalar_lea.vmem %s1008_s26, 256 }
 0x146   : > { %p1184_p11 = scmp.ne.s32.totalorder %s1008_s26, %s1183_s9 }
 0x148   : > { %p1185_p12 = pnand %p1184_p11, %p1335_p5 }
 0x149   : > { %640 = vrot.lane.b32.xlu1 %v1499_v62, %s1261_s10  ;;  %s1266_s10 = smov [#allocation2]  }
 0x14a   : > { %p1186_p13 = pneg %p1185_p12  ;;  %s1187_s22 = sshll.u32 %s1266_s10, 4  ;;  %s1188_s22 = int_to_ptr.vmem [resolvable:$false] %s1187_s22 }
 0x14b   : > { %p1190_p0 = scmp.lt.s32.totalorder %s1008_s26, %s1188_s22 }
 0x14d   : > { %702 = vrot.lane.b32.xlu1 %v1499_v62, %s1262_s11  ;;  %s1189_s11 = scalar_lea.vmem %s1188_s22, 512 }
 0x14e   : > { %p1191_p1 = scmp.lt.s32.totalorder %s1189_s11, %s1183_s9 }
 0x150   : > { %p1192_p2 = por %p1191_p1, %p1190_p0 }
 0x151   : > { %764 = vrot.lane.b32.xlu1 %v1499_v62, %s1263_s12 }
 0x152   : > { %p1193_p3 = pnand %p1192_p2, %p1186_p13 }
 0x155   : > { %826 = vrot.lane.b32.xlu1 %v1499_v62, %s1264_s13 }
 0x157   : > { %v1557_v14 = vpop.permute.xlu0 %420  ;;  %v358_v15 = vpop.permute.xlu1 %357 }
 0x159   : > { %822 = vrot.lane.b32.xlu1 %v1429_v43, %s1264_s13 }
 0x15b   : > { %v489_v16 = vpop.permute.xlu0 %488  ;;  %v483_v17 = vpop.permute.xlu1 %482 }
 0x15c   : > { %v495_v18 = vsel %vm494_vm2, %v483_v17, %v489_v16  ;;  %v498_v19 = vsel %vm494_vm2, %v489_v16, %v483_v17  ;;  %v1621_v16 = vrot.slane %v1079_v46, %v1593_v45 }
 0x15d   : > { %879 = vperm.xlu1 %1178, %v1349_v1  }
 0x15f   : > { %v551_v20 = vpop.permute.xlu0 %550  ;;  %v545_v21 = vpop.permute.xlu1 %544 }
 0x160   : > { %v557_v28 = vsel %vm556_vm3, %v545_v21, %v551_v20  ;;  %v560_v29 = vsel %vm556_vm3, %v551_v20, %v545_v21  ;;  %v1629_v21 = vrot.slane %v1078_v51, %v1591_v44 }
 0x161   : > { %1180 = vset.pattern.permute.xlu1 %v1265_v35  ;;  %v1638_v35 = vrot.slane %v1080_v52, %v1593_v45 }
 0x162   : > { %912 = vperm.xlu1 %1180, %v1349_v1   ;;  %v378_v1 = vld [vmem:[%s1939_s3] ss:$8 sm:$0x3] }
 0x163   : > { %v637_v30 = vpop.permute.xlu0 %636  ;;  %v631_v31 = vpop.permute.xlu1 %630  ;;  %v1612_v57 = vrot.slane %v378_v1, %v1591_v44  ;;  %v1615_v59 = vrot.slane %v378_v1, %v1593_v45  ;;  %v577_v2 = vmul.f32 %v1638_v35, %v557_v28 }
 0x164   : > { %v1575_v33 = vsel %vm642_vm4, %v631_v31, %v637_v30  ;;  %v1579_v34 = vsel %vm642_vm4, %v637_v30, %v631_v31  ;;  %v1632_v30 = vrot.slane %v1078_v51, %v1593_v45  ;;  %v1635_v31 = vrot.slane %v1080_v52, %v1591_v44 }
 0x165   : > { %v514_v52 = vmul.f32 %v1618_v12, %v498_v19 }
 0x167   : > { %v699_v37 = vpop.permute.xlu0 %698  ;;  %v693_v38 = vpop.permute.xlu1 %692  ;;  %v532_v5 = vmul.f32 %v1417_v26, %v514_v52 }
 0x168   : > { %v1585_v40 = vsel %vm704_vm5, %v693_v38, %v699_v37  ;;  %v1589_v41 = vsel %vm704_vm5, %v699_v37, %v693_v38  ;;  %v1641_v37 = vrot.slane %v1081_v54, %v1591_v44  ;;  %v1647_v38 = vrot.slane %v1081_v54, %v1593_v45 }
 0x16a   : > { %v662_v52 = vmul.f32 %v1641_v37, %v1575_v33  ;;  %v725_v33 = vmul.f32 %v1679_v9, %v1589_v41 }
 0x16b   : > { %v755_v42 = vpop.permute.xlu1 %754  ;;  %v1657_v10 = vpop.permute.xlu0 %422 }
 0x16f   : > { %v364_v61 = vpop.permute.xlu1 %363 }
 0x170   : > { %v372_v17 = vsel %vm371_vm6, %v358_v15, %v364_v61  ;;  %v375_v20 = vsel %vm371_vm6, %v364_v61, %v358_v15  ;;  %v1083_v15 = vld [vmem:[%s1939_s3 + $0x7] ss:$8 sm:$0x3]  ;;  %v515_v61 = vmul.f32 %v1621_v16, %v495_v18  ;;  %v576_v18 = vmul.f32 %v1635_v31, %v560_v29 }
 0x171   : > { %v390_v1 = vmul.f32 %v1612_v57, %v375_v20  ;;  %v391_v46 = vmul.f32 %v1615_v59, %v372_v17  ;;  %v1668_v7 = vrot.slane %v1083_v15, %v1591_v44  ;;  %v1671_v19 = vrot.slane %v1083_v15, %v1593_v45 }
 0x172   : > { %v533_v29 = vmul.f32 %v1417_v26, %v515_v61  ;;  %v663_v26 = vmul.f32 %v1647_v38, %v1579_v34  ;;  %v485_v61 = vpop.permute.xlu0 %484 }
 0x173   : > { %v427_v51 = vpop.permute.xlu1 %426 }
 0x174   : > { %v433_v54 = vsel %vm432_vm7, %v1557_v14, %v427_v51  ;;  %v436_v3 = vsel %vm432_vm7, %v427_v51, %v1557_v14  ;;  %v415_v14 = vmul.f32 %v1472_v53, %v391_v46  ;;  %v594_v46 = vmul.f32 %v1494_v60, %v576_v18 }
 0x175   : > { %v452_v20 = vmul.f32 %v1629_v21, %v436_v3  ;;  %v453_v17 = vmul.f32 %v1632_v30, %v433_v54  ;;  %v414_v3 = vmul.f32 %v1472_v53, %v390_v1 }
 0x177   : > { %v470_v51 = vmul.f32 %v1415_v25, %v452_v20  ;;  %v471_v54 = vmul.f32 %v1415_v25, %v453_v17  ;;  %v761_v15 = vpop.permute.xlu1 %760  ;;  %v595_v25 = vmul.f32 %v1494_v60, %v577_v2  ;;  %v619_v60 = vmul.f32 %v1510_v0, %v1429_v43 }
 0x178   : > { %v767_v28 = vsel %vm766_vm8, %v755_v42, %v761_v15  ;;  %v770_v39 = vsel %vm766_vm8, %v761_v15, %v755_v42  ;;  %v724_v2 = vmul.f32 %v1676_v63, %v1585_v40  ;;  %v1711_v15 = vpop.permute.xlu0 %818  ;;  %v743_v43 = vmul.f32 %v1537_v8, %v725_v33 }
 0x179   : > { %v476_v45 = vadd.f32 %v470_v51, %v414_v3  ;;  %v477_v44 = vadd.f32 %v471_v54, %v415_v14  ;;  %v786_v1 = vmul.f32 %v1668_v7, %v767_v28  ;;  %v787_v53 = vmul.f32 %v1671_v19, %v770_v39 }
 0x17a   : > { %v618_v51 = vmul.f32 %v1510_v0, %v1423_v36  ;;  %v742_v36 = vmul.f32 %v1537_v8, %v724_v2 }
 0x17b   : > { %v538_v20 = vadd.f32 %v532_v5, %v476_v45  ;;  %v539_v17 = vadd.f32 %v533_v29, %v477_v44  ;;  %v804_v42 = vmul.f32 %v1551_v11, %v786_v1  ;;  %v805_v3 = vmul.f32 %v1551_v11, %v787_v53  ;;  %v360_v14 = vpop.permute.xlu1 %359 }
 0x17c   : > { %v680_v44 = vmul.f32 %v1524_v4, %v662_v52  ;;  %v681_v45 = vmul.f32 %v1524_v4, %v663_v26  ;;  %v366_v53 = vpop.permute.xlu0 %365 }
 0x17d   : > { %v600_v34 = vadd.f32 %v594_v46, %v538_v20  ;;  %v601_v5 = vadd.f32 %v595_v25, %v539_v17  ;;  %v373_v52 = vsel %vm371_vm6, %v360_v14, %v366_v53  ;;  %v376_v8 = vsel %vm371_vm6, %v366_v53, %v360_v14 }
 0x17e   : > { %v392_v20 = vmul.f32 %v1612_v57, %v376_v8  ;;  %v393_v17 = vmul.f32 %v1615_v59, %v373_v52 }
 0x17f   : > { %v547_v11 = vpop.permute.xlu1 %546  ;;  %v625_v18 = vadd.f32 %v619_v60, %v601_v5  ;;  %v624_v54 = vadd.f32 %v618_v51, %v600_v34 }
 0x180   : > { %v553_v25 = vpop.permute.xlu0 %552 }
 0x181   : > { %v687_v0 = vadd.f32 %v681_v45, %v625_v18  ;;  %v686_v40 = vadd.f32 %v680_v44, %v624_v54  ;;  %v558_v51 = vsel %vm556_vm3, %v547_v11, %v553_v25  ;;  %v561_v60 = vsel %vm556_vm3, %v553_v25, %v547_v11 }
 0x182   : > { %v578_v45 = vmul.f32 %v1635_v31, %v561_v60  ;;  %v416_v54 = vmul.f32 %v1409_v22, %v392_v20 }
 0x183   : > { %v633_v29 = vpop.permute.xlu1 %632  ;;  %v749_v28 = vadd.f32 %v743_v43, %v687_v0  ;;  %v748_v41 = vadd.f32 %v742_v36, %v686_v40  ;;  %v417_v36 = vmul.f32 %v1409_v22, %v393_v17 }
 0x184   : > { %v639_v33 = vpop.permute.xlu0 %638  ;;  %v596_v22 = vmul.f32 %v1421_v32, %v578_v45 }
 0x185   : > { %v1715_v39 = vadd.f32 %v805_v3, %v749_v28  ;;  %v1717_v1 = vadd.f32 %v804_v42, %v748_v41  ;;  %v647_v40 = vsel %vm642_vm4, %v639_v33, %v633_v29 }
 0x186   : > { %v665_v20 = vmul.f32 %v1647_v38, %v647_v40 }
 0x187   : > { %v1719_v4 = vpop.permute.xlu1 %694 }
 0x188   : > { %v701_v8 = vpop.permute.xlu0 %700 }
 0x18b   : > { %v1721_v46 = vpop.permute.xlu1 %756 }
 0x18f   : > { %v429_v26 = vpop.permute.xlu1 %428 }
 0x190   : > { %v434_v42 = vsel %vm432_vm7, %v1657_v10, %v429_v26  ;;  %v437_v3 = vsel %vm432_vm7, %v429_v26, %v1657_v10  ;;  %v579_v10 = vmul.f32 %v1638_v35, %v558_v51 }
 0x191   : > { %v454_v14 = vmul.f32 %v1629_v21, %v437_v3  ;;  %v455_v2 = vmul.f32 %v1632_v30, %v434_v42 }
 0x192   : > { %v597_v52 = vmul.f32 %v1421_v32, %v579_v10 }
 0x193   : > { %v472_v34 = vmul.f32 %v1413_v24, %v454_v14  ;;  %v473_v5 = vmul.f32 %v1413_v24, %v455_v2  ;;  %v491_v44 = vpop.permute.xlu1 %490  ;;  %v644_v24 = vsel %vm642_vm4, %v633_v29, %v639_v33  ;;  %v763_v33 = vpop.permute.xlu0 %762 }
 0x194   : > { %v496_v18 = vsel %vm494_vm2, %v485_v61, %v491_v44  ;;  %v499_v11 = vsel %vm494_vm2, %v491_v44, %v485_v61  ;;  %v664_v26 = vmul.f32 %v1641_v37, %v644_v24 }
 0x195   : > { %v516_v43 = vmul.f32 %v1618_v12, %v499_v11  ;;  %v517_v0 = vmul.f32 %v1621_v16, %v496_v18  ;;  %v478_v28 = vadd.f32 %v472_v34, %v416_v54  ;;  %v479_v41 = vadd.f32 %v473_v5, %v417_v36 }
 0x196   : > { %v682_v60 = vmul.f32 %v1528_v6, %v664_v26 }
 0x197   : > { %v534_v53 = vmul.f32 %v1478_v55, %v516_v43  ;;  %v535_v61 = vmul.f32 %v1478_v55, %v517_v0  ;;  %v1759_v25 = vpop.permute.xlu1 %824  ;;  %v683_v55 = vmul.f32 %v1528_v6, %v665_v20  ;;  %v635_v45 = vpop.permute.xlu0 %634 }
 0x199   : > { %v540_v17 = vadd.f32 %v534_v53, %v478_v28  ;;  %v541_v42 = vadd.f32 %v535_v61, %v479_v41 }
 0x19b   : > { %v602_v29 = vadd.f32 %v596_v22, %v540_v17  ;;  %v603_v3 = vadd.f32 %v597_v52, %v541_v42  ;;  %v362_v51 = vpop.permute.xlu1 %361  ;;  %v697_v18 = vpop.permute.xlu0 %696  ;;  %v709_v42 = vsel %vm704_vm5, %v701_v8, %v1719_v4 }
 0x19d   : > { %v626_v14 = vadd.f32 %v1435_v47, %v602_v29  ;;  %v627_v2 = vadd.f32 %v1437_v48, %v603_v3 }
 0x19f   : > { %v425_v32 = vpop.permute.xlu1 %424  ;;  %v1769_v34 = vadd.f32 %v682_v60, %v626_v14  ;;  %v1771_v5 = vadd.f32 %v683_v55, %v627_v2  ;;  %v1773_v54 = vpop.permute.xlu0 %758  ;;  %v771_v60 = vsel %vm766_vm8, %v763_v33, %v1721_v46  ;;  %v1084_v55 = vld [vmem:[%s1939_s3 + $0x10] ss:$8 sm:$0x3] }
 0x1a3   : > { %v487_v44 = vpop.permute.xlu1 %486  ;;  %v1775_v43 = vpop.permute.xlu0 %820 }
 0x1a7   : > { %v549_v10 = vpop.permute.xlu1 %548  ;;  %v493_v28 = vpop.permute.xlu0 %492 }
 0x1a8   : > { %v497_v22 = vsel %vm494_vm2, %v487_v44, %v493_v28  ;;  %v500_v52 = vsel %vm494_vm2, %v493_v28, %v487_v44  ;;  %v727_v44 = vmul.f32 %v1679_v9, %v709_v42 }
 0x1ab   : > { %v368_v11 = vpop.permute.xlu1 %367 }
 0x1ac   : > { %v374_v6 = vsel %vm371_vm6, %v362_v51, %v368_v11  ;;  %v377_v0 = vsel %vm371_vm6, %v368_v11, %v362_v51 }
 0x1ad   : > { %v394_v41 = vmul.f32 %v1612_v57, %v377_v0  ;;  %v395_v53 = vmul.f32 %v1615_v59, %v374_v6  ;;  %v1962_v6 = vld [vmem:[#allocation12_spill] sm:$0xff] }
 0x1ae   : > { %v841_v0 = vrot.slane %v1084_v55, %v1962_v6 }
 0x1af   : > { %v431_v36 = vpop.permute.xlu1 %430  ;;  %v418_v57 = vmul.f32 %v1460_v49, %v394_v41  ;;  %v419_v59 = vmul.f32 %v1460_v49, %v395_v53  ;;  %v706_v49 = vsel %vm704_vm5, %v1719_v4, %v701_v8  ;;  %v622_v4 = vmul.f32 %v1485_v58, %v1480_v56  ;;  %v1963_v53 = vld [vmem:[#allocation8_spill] sm:$0xff] }
 0x1b0   : > { %v435_v47 = vsel %vm432_vm7, %v425_v32, %v431_v36  ;;  %v438_v48 = vsel %vm432_vm7, %v431_v36, %v425_v32  ;;  %v726_v11 = vmul.f32 %v1676_v63, %v706_v49  ;;  %v1831_v36 = vpop.permute.xlu0 %855  ;;  %v789_v56 = vmul.f32 %v1671_v19, %v771_v60 }
 0x1b1   : > { %v456_v24 = vmul.f32 %v1629_v21, %v438_v48  ;;  %v457_v40 = vmul.f32 %v1632_v30, %v435_v47  ;;  %v518_v21 = vmul.f32 %v1618_v12, %v500_v52  ;;  %v519_v30 = vmul.f32 %v1621_v16, %v497_v22 }
 0x1b2   : > { %v768_v48 = vsel %vm766_vm8, %v1721_v46, %v763_v33  ;;  %v745_v22 = vmul.f32 %v1963_v53, %v727_v44  ;;  %v744_v52 = vmul.f32 %v1963_v53, %v726_v11 }
 0x1b3   : > { %v474_v26 = vmul.f32 %v1411_v23, %v456_v24  ;;  %v475_v20 = vmul.f32 %v1411_v23, %v457_v40  ;;  %v536_v14 = vmul.f32 %v1467_v50, %v518_v21  ;;  %v537_v2 = vmul.f32 %v1467_v50, %v519_v30  ;;  %v1965_v21 = vld [vmem:[#allocation9_spill] sm:$0xff] }
 0x1b4   : > { %v807_v30 = vmul.f32 %v1965_v21, %v789_v56 }
 0x1b5   : > { %v480_v23 = vadd.f32 %v474_v26, %v418_v57  ;;  %v481_v51 = vadd.f32 %v475_v20, %v419_v59  ;;  %v788_v20 = vmul.f32 %v1668_v7, %v768_v48  ;;  %v751_v57 = vadd.f32 %v745_v22, %v1771_v5  ;;  %v817_v59 = vpop.permute.xlu0 %816 }
 0x1b7   : > { %v542_v50 = vadd.f32 %v536_v14, %v480_v23  ;;  %v543_v47 = vadd.f32 %v537_v2, %v481_v51  ;;  %v750_v51 = vadd.f32 %v744_v52, %v1769_v34  ;;  %v813_v34 = vadd.f32 %v807_v30, %v751_v57 }
 0x1b9   : > { %v884_v11 = vpop.permute.xlu0 %883 }
 0x1bc   : > { %v1789_v61 = vpop.permute.xlu1 %887 }
 0x1c0   : > { %v555_v17 = vpop.permute.xlu1 %554 }
 0x1c1   : > { %v559_v29 = vsel %vm556_vm3, %v549_v10, %v555_v17  ;;  %v562_v3 = vsel %vm556_vm3, %v555_v17, %v549_v10 }
 0x1c2   : > { %v580_v12 = vmul.f32 %v1635_v31, %v562_v3  ;;  %v581_v16 = vmul.f32 %v1638_v35, %v559_v29  ;;  %v1966_v29 = vld [vmem:[#allocation5_spill] sm:$0xff] }
 0x1c4   : > { %v598_v31 = vmul.f32 %v1419_v27, %v580_v12  ;;  %v599_v35 = vmul.f32 %v1419_v27, %v581_v16  ;;  %v641_v32 = vpop.permute.xlu1 %640  ;;  %v623_v27 = vmul.f32 %v1485_v58, %v1499_v62  ;;  %v1964_v58 = vld [vmem:[#allocation13_spill] sm:$0xff] }
 0x1c5   : > { %v645_v8 = vsel %vm642_vm4, %v635_v45, %v641_v32  ;;  %v648_v10 = vsel %vm642_vm4, %v641_v32, %v635_v45  ;;  %v845_v62 = vrot.slane %v1084_v55, %v1964_v58  ;;  %v806_v55 = vmul.f32 %v1965_v21, %v788_v20 }
 0x1c6   : > { %v604_v45 = vadd.f32 %v598_v31, %v542_v50  ;;  %v605_v24 = vadd.f32 %v599_v35, %v543_v47  ;;  %v666_v40 = vmul.f32 %v1641_v37, %v645_v8  ;;  %v667_v28 = vmul.f32 %v1647_v38, %v648_v10  ;;  %v1968_v35 = vld [vmem:[#allocation7_spill] sm:$0xff] }
 0x1c7   : > { %v833_v37 = vsel %vm828_vm9, %v1759_v25, %v1711_v15  ;;  %v1969_v8 = vld [vmem:[#allocation11_spill] sm:$0xff] }
 0x1c8   : > { %v703_v41 = vpop.permute.xlu1 %702  ;;  %v628_v17 = vadd.f32 %v622_v4, %v604_v45  ;;  %v629_v42 = vadd.f32 %v623_v27, %v605_v24  ;;  %v684_v3 = vmul.f32 %v1966_v29, %v666_v40  ;;  %v1970_v45 = vld [vmem:[#allocation10_spill] sm:$0xff] }
 0x1c9   : > { %v707_v46 = vsel %vm704_vm5, %v697_v18, %v703_v41  ;;  %v710_v33 = vsel %vm704_vm5, %v703_v41, %v697_v18  ;;  %v830_v18 = vsel %vm828_vm9, %v1711_v15, %v1759_v25  ;;  %v1967_v25 = vld [vmem:[#allocation6_spill] sm:$0xff] }
 0x1ca   : > { %v728_v38 = vmul.f32 %v1676_v63, %v707_v46  ;;  %v729_v26 = vmul.f32 %v1679_v9, %v710_v33  ;;  %v685_v63 = vmul.f32 %v1966_v29, %v667_v28  ;;  %v851_v9 = vmul.f32 %v845_v62, %v833_v37 }
 0x1cb   : > { %v850_v14 = vmul.f32 %v841_v0, %v830_v18  ;;  %v690_v2 = vadd.f32 %v684_v3, %v628_v17 }
 0x1cc   : > { %v765_v23 = vpop.permute.xlu1 %764  ;;  %v746_v5 = vmul.f32 %v1967_v25, %v728_v38  ;;  %v747_v16 = vmul.f32 %v1967_v25, %v729_v26  ;;  %v691_v31 = vadd.f32 %v685_v63, %v629_v42  ;;  %v869_v10 = vmul.f32 %v1969_v8, %v851_v9 }
 0x1cd   : > { %v769_v12 = vsel %vm766_vm8, %v1773_v54, %v765_v23  ;;  %v772_v15 = vsel %vm766_vm8, %v765_v23, %v1773_v54  ;;  %v812_v54 = vadd.f32 %v806_v55, %v750_v51  ;;  %v868_v56 = vmul.f32 %v1969_v8, %v850_v14 }
 0x1ce   : > { %v790_v49 = vmul.f32 %v1668_v7, %v769_v12  ;;  %v791_v60 = vmul.f32 %v1671_v19, %v772_v15  ;;  %v752_v50 = vadd.f32 %v746_v5, %v690_v2  ;;  %v753_v47 = vadd.f32 %v747_v16, %v691_v31 }
 0x1cf   : > { %v875_v6 = vadd.f32 %v869_v10, %v813_v34  ;;  %v874_v22 = vadd.f32 %v868_v56, %v812_v54 }
 0x1d0   : > { %v808_v32 = vmul.f32 %v1968_v35, %v790_v49  ;;  %v809_v44 = vmul.f32 %v1968_v35, %v791_v60  ;;  %v827_v4 = vpop.permute.xlu1 %826 }
 0x1d1   : > { %v831_v7 = vsel %vm828_vm9, %v1775_v43, %v827_v4  ;;  %v834_v19 = vsel %vm828_vm9, %v827_v4, %v1775_v43  ;;  %v893_v58 = vadd.f32 %v884_v11, %v875_v6  ;;  %v892_v26 = vadd.f32 %v884_v11, %v874_v22 }
 0x1d2   : > { %v852_v27 = vmul.f32 %v841_v0, %v831_v7  ;;  %v853_v48 = vmul.f32 %v845_v62, %v834_v19  ;;  %v815_v41 = vadd.f32 %v809_v44, %v753_v47  ;;  %v814_v53 = vadd.f32 %v808_v32, %v752_v50 }
 0x1d3   : > { %v899_v57 = vmax.f32 %v893_v58, 0.0 }
 0x1d4   : > { %v870_v24 = vmul.f32 %v1970_v45, %v852_v27  ;;  %v871_v40 = vmul.f32 %v1970_v45, %v853_v48  ;;  %v823_v28 = vpop.permute.xlu1 %822 }
 0x1d5   : > { %v829_v43 = vsel %vm828_vm9, %v817_v59, %v823_v28  ;;  %v832_v46 = vsel %vm828_vm9, %v823_v28, %v817_v59  ;;  %v905_v9 = vmin.f32 %v899_v57, 6.0 }
 0x1d6   : > { %v848_v33 = vmul.f32 %v841_v0, %v829_v43  ;;  %v849_v52 = vmul.f32 %v845_v62, %v832_v46  ;;  %v877_v37 = vadd.f32 %v871_v40, %v815_v41  ;;  %v876_v38 = vadd.f32 %v870_v24, %v814_v53 }
 0x1d7   : > { %v898_v0 = vmax.f32 %v892_v26, 0.0 }
 0x1d8   : > { %v866_v20 = vmul.f32 %v1831_v36, %v848_v33  ;;  %v867_v21 = vmul.f32 %v1831_v36, %v849_v52  ;;  %v895_v30 = vadd.f32 %v1789_v61, %v877_v37  ;;  %v894_v18 = vadd.f32 %v1789_v61, %v876_v38  ;;  %v880_v62 = vpop.permute.xlu1 %879 }
 0x1d9   : > { %v904_v61 = vmin.f32 %v898_v0, 6.0 }
 0x1da   : > { %v873_v17 = vadd.f32 %v867_v21, %v1715_v39  ;;  %v872_v42 = vadd.f32 %v866_v20, %v1717_v1  ;;  %v901_v13 = vmax.f32 %v895_v30, 0.0  ;;  %v900_v59 = vmax.f32 %v894_v18, 0.0  ;;  %v908_v1 = vld [vmem:[%s1940_s4] sm:$0xff] }
 0x1dc   : > { %v890_v29 = vadd.f32 %v880_v62, %v872_v42  ;;  %v891_v3 = vadd.f32 %v880_v62, %v873_v17  ;;  %v907_v63 = vmin.f32 %v901_v13, 6.0  ;;  %v906_v23 = vmin.f32 %v900_v59, 6.0 }
 0x1dd   : > { %v913_v15 = vpop.permute.xlu1 %912 }
 0x1de   : > { %v896_v36 = vmax.f32 %v890_v29, 0.0  ;;  %v897_v51 = vmax.f32 %v891_v3, 0.0  ;;  %945 = vmatprep.subr.mxu1 %v907_v63 }
 0x1df   : > { %946 = vmatpush1.msra.mxu1 %v906_v23 }
 0x1e0   : > { %v902_v12 = vmin.f32 %v896_v36, 6.0  ;;  %v903_v39 = vmin.f32 %v897_v51, 6.0  ;;  %947 = vmatprep.subr.mxu1 %v905_v9 }
 0x1e1   : > { %948 = vmatpush1.msra.mxu1 %v904_v61 }
 0x1e2   : > { %949 = vmatprep.subr.mxu1 %v903_v39 }
 0x1e3   : > { %950 = vmatpush1.msra.mxu1 %v902_v12 }
 0x1e4   : > { %1085 = vmatmul.mubr.msk.f32.vlgmr.msra.gmra.mxu1 %vm915_vm10, %v908_v1 }
 0x2a4   : > { %v985_v25 = vpop.f32.mrf.mxu1 }
 0x2a5   : > { %v986_v5 = vadd.f32 %v985_v25, %v913_v15 }
 0x2a6   : > { %v987_v16 = vpop.f32.mrf.mxu1 }
 0x2a7   : > { %990 = vst [vmem:[%s217_s25] sm:$0xff] %v986_v5  ;;  %v988_v49 = vadd.f32 %v987_v16, %v913_v15 }
 0x2a9   : > { %991 = vst [vmem:[%s217_s25 + $0x8] sm:$0xff] %v988_v49 }
 0x2aa   : > { %1196 = shalt.err (!%p1193_p3)
}
 0x2ab   : > { %s1197_s12 = scalar_lea.hbm %s1005_s7, 256  ;;  %s1201_s15 = scalar_lea.hbm %s1941_s5, 512 }
 0x2ac   : > { %p1198_p4 = scmp.ne.s32.totalorder %s1005_s7, %s1197_s12  ;;  %p1202_p9 = scmp.lt.s32.totalorder %s1005_s7, %s1941_s5 }
 0x2ad   : > { %p1203_p10 = scmp.lt.s32.totalorder %s1201_s15, %s1197_s12 }
 0x2ae   : > { %p1199_p7 = pnand %p1198_p4, %p1335_p5 }
 0x2af   : > { %p1204_p11 = por %p1203_p10, %p1202_p9 }
 0x2b0   : > { %p1200_p8 = pneg %p1199_p7 }
 0x2b2   : > { %p1205_p12 = pnand %p1204_p11, %p1200_p8 }
 0x2b4   : > { %1208 = shalt.err (!%p1205_p12)
}
 0x2b5   : > { %1093 = dma.vmem_to_hbm [thread:$0]  (%p1335_p5), %s1008_s26, 256, %s1005_s7, %s993_s8  }
 0x2b6 PF: > { %p1099_p13 = scmp.ge.s32.totalorder %s1243_s21, 2  ;;  %s1019_s23 = sand.u32 1, %s1231_s18  }
 0x2b7   : > { %s1020_s25 = scalar_lea.sflag [#allocation3], %s1019_s23 }
 0x2b8   : > { %p1096_p0 = pnand %p1099_p13, %p1339_p6 }
 0x2ba   : > { %p1097_p1 = pneg %p1096_p0 }
 0x2bc   : > { %1226 = dma.done.wait (%p1097_p1), %s1020_s25, 256  }
 0x2bd   : > { %1228 = vsyncadd (%p1097_p1), %s1020_s25, 4294967040  ;;  %p15_p2 = scmp.ge.s32.totalorder %s1322_s24, 4   ;;  %s1971_s18 = smov %s1235_s19 }
 0x2be   : > { %s1972_s19 = smov %s1239_s20  ;;  %s1973_s20 = smov %s1333_s27 }
 0x2bf   : > { %s1974_s21 = smov %s1322_s24  ;;  %17 = sbr.rel (!%p15_p2) target bundleno = 3 (0x3), region = 82 }
 0x2c4   :  { %1025 = vsyncpa [#allocation3], 1 }
 0x2c5   :  { %1027 = vsyncpa [#allocation3 + $0x1], 1 }

</bundles_post_ra>
